<compile_context>
chip_gen: v6e
topology: v6e:2x2x1
jax: 0.10.0
libtpu: 0.0.40
codegen_flags: <defaults>
</compile_context>

<pallas_src>
import functools
import math

import jax
import jax.numpy as jnp
from jax.experimental import pallas as pl
from jax.experimental.pallas import tpu as pltpu

# Dtype fed to the MXU. bf16 => full MXU rate on v5e/v6e/v7x and half the
# operand HBM/VMEM traffic; accumulation stays f32 (preferred_element_type),
# softmax stays f32 on the VPU/EUP. Set to jnp.float32 for strict parity.
MXU_DTYPE = jnp.bfloat16


# ---------------------------------------------------------------------------
# Kernel 1: tiled matmul + bias   y = x @ w + b
# ---------------------------------------------------------------------------
def _linear_kernel(x_ref, w_ref, b_ref, o_ref, acc_ref):
    @pl.when(pl.program_id(2) == 0)
    def _():
        acc_ref[...] = jnp.zeros_like(acc_ref)

    # Operands arrive already in MXU_DTYPE (cast once outside), no per-tile cast.
    acc_ref[...] += jnp.dot(x_ref[...], w_ref[...],
                            preferred_element_type=jnp.float32)

    @pl.when(pl.program_id(2) == pl.num_programs(2) - 1)
    def _():
        o_ref[...] = (acc_ref[...] + b_ref[...]).astype(o_ref.dtype)


def linear(x2d, w, b, *, out_dtype=None, tm=512, tn=512, tk=256):
    """x2d: (M, K), w: (K, N) (already transposed vs. torch), b: (N,)."""
    M, K = x2d.shape
    K2, N = w.shape
    assert K == K2
    out_dtype = x2d.dtype if out_dtype is None else out_dtype
    b2d = b.reshape(1, N).astype(jnp.float32)

    tm, tn, tk = min(tm, M), min(tn, N), min(tk, K)
    # Ragged-tile guard: partial blocks are not masked in the kernel, so the
    # (clamped) tiles must divide the problem. Pad inputs upstream otherwise.
    if M % tm or N % tn or K % tk:
        raise ValueError(
            f"linear(): dims ({M},{K},{N}) not divisible by tiles ({tm},{tk},{tn})")

    grid = (M // tm, N // tn, K // tk)
    return pl.pallas_call(
        _linear_kernel,
        out_shape=jax.ShapeDtypeStruct((M, N), out_dtype),
        grid_spec=pltpu.PrefetchScalarGridSpec(
            num_scalar_prefetch=0,
            grid=grid,
            in_specs=[
                pl.BlockSpec((tm, tk), lambda i, j, k: (i, k)),
                pl.BlockSpec((tk, tn), lambda i, j, k: (k, j)),
                pl.BlockSpec((1, tn), lambda i, j, k: (0, j)),
            ],
            out_specs=pl.BlockSpec((tm, tn), lambda i, j, k: (i, j)),
            scratch_shapes=[pltpu.VMEM((tm, tn), jnp.float32)],
        ),
        compiler_params=pltpu.CompilerParams(
            dimension_semantics=("parallel", "parallel", "arbitrary")),
    )(x2d, w, b2d)


# ---------------------------------------------------------------------------
# Kernel 2: attention. Grid (batch,); all heads handled by one batched einsum
# per matmul (heads = batch dim). Outputs:
#   ctx   : (B, T, H*Dh)  lane-dense, consumed directly by the out projection
#   k_cat : (B, H, T, Dh) f32   (module output, produced in-kernel — no XLA
#   v_cat : (B, H, T, Dh) f32    transpose pass over HBM)
# ---------------------------------------------------------------------------
def _attn_kernel(qkv_ref, ctx_ref, kcat_ref, vcat_ref, *,
                 n_heads, head_dim, seq_len):
    T, H, Dh = seq_len, n_heads, head_dim
    inner = H * Dh
    qkv = qkv_ref[0]                                   # (T, 3*inner), MXU_DTYPE

    # Split q/k/v and bring heads to the batch (leading) dim once.
    q = qkv[:, :inner].reshape(T, H, Dh)
    k = qkv[:, inner:2 * inner].reshape(T, H, Dh)
    v = qkv[:, 2 * inner:].reshape(T, H, Dh)
    q_hm = jnp.transpose(q, (1, 0, 2))                 # (H, T, Dh)
    k_hm = jnp.transpose(k, (1, 0, 2))
    v_hm = jnp.transpose(v, (1, 0, 2))

    # k_cat / v_cat module outputs fall out of data already in VMEM.
    kcat_ref[0] = k_hm.astype(kcat_ref.dtype)
    vcat_ref[0] = v_hm.astype(vcat_ref.dtype)

    # Scores: softmax scale is pre-folded into the q weights/bias.
    s = jnp.einsum("hqd,hkd->hqk", q_hm, k_hm,
                   preferred_element_type=jnp.float32)  # (H, T, T) f32

    # Causal mask built in-kernel from iota. The PyTorch buffer adds +1.0 to
    # every allowed entry of a row (a per-row constant) which cancels in
    # softmax, so masking with -inf is equivalent after softmax.
    row = jax.lax.broadcasted_iota(jnp.int32, (T, T), 0)
    col = jax.lax.broadcasted_iota(jnp.int32, (T, T), 1)
    s = jnp.where((col <= row)[None], s, -jnp.inf)

    m = jnp.max(s, axis=-1, keepdims=True)             # (H, T, 1) f32, VPU
    e = jnp.exp(s - m)                                  # EUP
    denom = jnp.sum(e, axis=-1, keepdims=True)

    ctx = jnp.einsum("hqk,hkd->hqd", e.astype(qkv.dtype), v_hm,
                     preferred_element_type=jnp.float32)  # (H, T, Dh) f32
    # one reciprocal per row on the EUP slot instead of a (T,T) divide
    ctx = ctx * pl.reciprocal(denom, approx=True)

    # single lane-dense (T, H*Dh) store
    ctx_ref[0] = jnp.transpose(ctx, (1, 0, 2)).reshape(T, inner).astype(ctx_ref.dtype)


def attention(qkv3d, *, n_heads, head_dim):
    """qkv3d: (B, T, 3*inner). Returns (ctx (B,T,inner), k_cat, v_cat (B,H,T,Dh))."""
    B, T, three_inner = qkv3d.shape
    inner = n_heads * head_dim
    assert three_inner == 3 * inner

    kernel = functools.partial(_attn_kernel, n_heads=n_heads,
                               head_dim=head_dim, seq_len=T)
    return pl.pallas_call(
        kernel,
        out_shape=(
            jax.ShapeDtypeStruct((B, T, inner), qkv3d.dtype),
            jax.ShapeDtypeStruct((B, n_heads, T, head_dim), jnp.float32),
            jax.ShapeDtypeStruct((B, n_heads, T, head_dim), jnp.float32),
        ),
        grid=(B,),
        in_specs=[pl.BlockSpec((1, T, three_inner), lambda b: (b, 0, 0))],
        out_specs=(
            pl.BlockSpec((1, T, inner), lambda b: (b, 0, 0)),
            pl.BlockSpec((1, n_heads, T, head_dim), lambda b: (b, 0, 0, 0)),
            pl.BlockSpec((1, n_heads, T, head_dim), lambda b: (b, 0, 0, 0)),
        ),
        compiler_params=pltpu.CompilerParams(
            dimension_semantics=("parallel",)),
    )(qkv3d)


# ---------------------------------------------------------------------------
# Parameters + forward glue
# ---------------------------------------------------------------------------
def init_mha_params(key, dim, n_heads, head_dim):
    inner = n_heads * head_dim
    keys = jax.random.split(key, 8)
    scale_in = 1.0 / math.sqrt(dim)
    scale_out = 1.0 / math.sqrt(inner)

    def lin(kw, kb, fan_in, fan_out, s):
        # torch.nn.Linear default init: U(-1/sqrt(fan_in), 1/sqrt(fan_in))
        w = jax.random.uniform(kw, (fan_out, fan_in), jnp.float32, -s, s)
        b = jax.random.uniform(kb, (fan_out,), jnp.float32, -s, s)
        return w, b

    params = {}
    params["q_w"], params["q_b"] = lin(keys[0], keys[1], dim, inner, scale_in)
    params["k_w"], params["k_b"] = lin(keys[2], keys[3], dim, inner, scale_in)
    params["v_w"], params["v_b"] = lin(keys[4], keys[5], dim, inner, scale_in)
    params["o_w"], params["o_b"] = lin(keys[6], keys[7], inner, dim, scale_out)
    return params


def prepare_params(params, head_dim):
    """Fuse q/k/v weights, fold the softmax scale into q, cast to MXU dtype.

    Done once outside the per-step forward (no per-tile casts in-kernel)."""
    scale = 1.0 / math.sqrt(head_dim)
    q_w = params["q_w"] * scale
    q_b = params["q_b"] * scale
    qkv_w = jnp.concatenate([q_w, params["k_w"], params["v_w"]], axis=0)  # (3I, dim)
    qkv_b = jnp.concatenate([q_b, params["k_b"], params["v_b"]], axis=0)  # (3I,)
    return {
        "qkv_w": qkv_w.T.astype(MXU_DTYPE),       # (dim, 3*inner), bf16 once
        "qkv_b": qkv_b.astype(jnp.float32),       # bias added in f32
        "o_w": params["o_w"].T.astype(MXU_DTYPE), # (inner, dim)
        "o_b": params["o_b"].astype(jnp.float32),
    }


def mha_forward(prep, x, *, n_heads, head_dim):
    B, T, dim = x.shape
    inner = n_heads * head_dim
    x2d = x.reshape(B * T, dim).astype(MXU_DTYPE)        # cast once

    # one fused QKV projection (single pallas_call, 3x wider MXU N)
    qkv2d = linear(x2d, prep["qkv_w"], prep["qkv_b"], out_dtype=MXU_DTYPE)
    qkv3d = qkv2d.reshape(B, T, 3 * inner)               # free row-major reshape

    ctx, k_cat, v_cat = attention(qkv3d, n_heads=n_heads, head_dim=head_dim)

    out = linear(ctx.reshape(B * T, inner), prep["o_w"], prep["o_b"],
                 out_dtype=jnp.float32).reshape(B, T, dim)
    return out, k_cat, v_cat


# ---------------------------------------------------------------------------
# Pure-JAX f32 reference (mirrors the PyTorch module, including the +1/-inf mask)
# ---------------------------------------------------------------------------
def build_causal_mask(max_seq):
    base = jnp.tril(jnp.ones((max_seq, max_seq), jnp.float32))
    return jnp.where(base == 0, -jnp.inf, base)


def mha_reference(params, mask_buf, x, n_heads, head_dim):
    B, T, dim = x.shape
    q = x @ params["q_w"].T + params["q_b"]
    k = x @ params["k_w"].T + params["k_b"]
    v = x @ params["v_w"].T + params["v_b"]
    q = q.reshape(B, T, n_heads, head_dim).transpose(0, 2, 1, 3)
    k = k.reshape(B, T, n_heads, head_dim).transpose(0, 2, 1, 3)
    v = v.reshape(B, T, n_heads, head_dim).transpose(0, 2, 1, 3)
    prod = jnp.einsum("bhtd,bhsd->bhts", q, k) / math.sqrt(head_dim)
    prod = prod + mask_buf[:T, :T][None, None]
    attn = jax.nn.softmax(prod, axis=-1)
    ctx = jnp.einsum("bhts,bhsd->bhtd", attn, v)
    ctx = ctx.transpose(0, 2, 1, 3).reshape(B, T, n_heads * head_dim)
    out = ctx @ params["o_w"].T + params["o_b"]
    return out, k, v


if __name__ == "__main__":
    # Small shapes consistent with the module.
    batch, seq, dim = 2, 8, 32
    n_heads, head_dim, max_seq = 4, 8, 16

    key = jax.random.PRNGKey(0)
    k_params, k_x = jax.random.split(key)
    params = init_mha_params(k_params, dim, n_heads, head_dim)
    prep = prepare_params(params, head_dim)
    x = jax.random.normal(k_x, (batch, seq, dim), jnp.float32)

    fwd = jax.jit(functools.partial(mha_forward, n_heads=n_heads,
                                    head_dim=head_dim))
    out, k_cat, v_cat = fwd(prep, x)
    (out, k_cat, v_cat) = jax.block_until_ready((out, k_cat, v_cat))

    mask_buf = build_causal_mask(max_seq)
    ref_out, ref_k, ref_v = mha_reference(params, mask_buf, x, n_heads, head_dim)

    assert out.shape == (batch, seq, dim)
    assert k_cat.shape == (batch, n_heads, seq, head_dim)
    assert v_cat.shape == (batch, n_heads, seq, head_dim)
    # bf16 MXU operands (weights + activations) vs. the pure-f32 reference:
    # per-element error is dominated by bf16 rounding of the projections.
    assert jnp.allclose(k_cat, ref_k, atol=3e-2, rtol=3e-2)
    assert jnp.allclose(v_cat, ref_v, atol=3e-2, rtol=3e-2)
    # output additionally goes through a bf16 p@v matmul, approx reciprocal
    # and the bf16 out-projection.
    assert jnp.allclose(out, ref_out, atol=5e-2, rtol=5e-2)

    print("KERNEL_OK")
</pallas_src>

<mosaic_0001>
module attributes {stable_mosaic.version = 11 : i64} {
  func.func @_linear_kernel(%arg0: i32, %arg1: i32, %arg2: i32, %arg3: memref<16x32xbf16, #tpu.memory_space<vmem>>, %arg4: memref<32x96xbf16, #tpu.memory_space<vmem>>, %arg5: memref<1x96xf32, #tpu.memory_space<vmem>>, %arg6: memref<16x96xbf16, #tpu.memory_space<vmem>>, %arg7: memref<16x96xf32, #tpu.memory_space<vmem>>) attributes {dimension_semantics = [#tpu.dimension_semantics<parallel>, #tpu.dimension_semantics<parallel>, #tpu.dimension_semantics<arbitrary>], iteration_bounds = array<i64: 1, 1, 1>, scalar_prefetch = 0 : i64, scratch_operands = 1 : i64, tpu.core_type = #tpu.core_type<tc>, window_params = [{transform_indices = @transform_0, window_bounds = array<i64: 16, 32>}, {transform_indices = @transform_1, window_bounds = array<i64: 32, 96>}, {transform_indices = @transform_2, window_bounds = array<i64: 1, 96>}, {transform_indices = @transform_3, window_bounds = array<i64: 16, 96>}]} {
    %c0_i32 = arith.constant 0 : i32
    %0 = arith.cmpi eq, %arg2, %c0_i32 : i32
    %1 = arith.extui %0 : i1 to i32
    %c0_i32_0 = arith.constant 0 : i32
    %2 = arith.cmpi ne, %1, %c0_i32_0 : i32
    scf.if %2 {
      %cst_10 = arith.constant 0.000000e+00 : f32
      %12 = vector.broadcast %cst_10 : f32 to vector<16x96xf32>
      %c0_11 = arith.constant 0 : index
      %c0_12 = arith.constant 0 : index
      %13 = vector.load %arg7[%c0_11, %c0_12] : memref<16x96xf32, #tpu.memory_space<vmem>>, vector<16x96xf32>
      tpu.vector_store %arg7[%c0_11, %c0_12], %12 {strides = array<i32>} : memref<16x96xf32, #tpu.memory_space<vmem>>, vector<16x96xf32>,
    } else {
    }
    %c0 = arith.constant 0 : index
    %c0_1 = arith.constant 0 : index
    %3 = vector.load %arg7[%c0, %c0_1] : memref<16x96xf32, #tpu.memory_space<vmem>>, vector<16x96xf32>
    %c0_2 = arith.constant 0 : index
    %c0_3 = arith.constant 0 : index
    %4 = vector.load %arg3[%c0_2, %c0_3] : memref<16x32xbf16, #tpu.memory_space<vmem>>, vector<16x32xbf16>
    %c0_4 = arith.constant 0 : index
    %c0_5 = arith.constant 0 : index
    %5 = vector.load %arg4[%c0_4, %c0_5] : memref<32x96xbf16, #tpu.memory_space<vmem>>, vector<32x96xbf16>
    %cst = arith.constant dense<0.000000e+00> : vector<16x96xf32>
    %6 = tpu.matmul %4, %5, %cst {dimension_numbers = #tpu.dot_dimension_numbers<[1], [0], [0], [1], [0, 0, 1, 1], [], []>} : vector<16x32xbf16>, vector<32x96xbf16>, vector<16x96xf32> -> vector<16x96xf32>
    %7 = arith.addf %3, %6 : vector<16x96xf32>
    %c0_6 = arith.constant 0 : index
    %c0_7 = arith.constant 0 : index
    %8 = vector.load %arg7[%c0_6, %c0_7] : memref<16x96xf32, #tpu.memory_space<vmem>>, vector<16x96xf32>
    tpu.vector_store %arg7[%c0_6, %c0_7], %7 {strides = array<i32>} : memref<16x96xf32, #tpu.memory_space<vmem>>, vector<16x96xf32>,
    %c0_i32_8 = arith.constant 0 : i32
    %9 = arith.cmpi eq, %arg2, %c0_i32_8 : i32
    %10 = arith.extui %9 : i1 to i32
    %c0_i32_9 = arith.constant 0 : i32
    %11 = arith.cmpi ne, %10, %c0_i32_9 : i32
    scf.if %11 {
      %c0_10 = arith.constant 0 : index
      %c0_11 = arith.constant 0 : index
      %12 = vector.load %arg7[%c0_10, %c0_11] : memref<16x96xf32, #tpu.memory_space<vmem>>, vector<16x96xf32>
      %c0_12 = arith.constant 0 : index
      %c0_13 = arith.constant 0 : index
      %13 = vector.load %arg5[%c0_12, %c0_13] : memref<1x96xf32, #tpu.memory_space<vmem>>, vector<1x96xf32>
      %14 = vector.broadcast %13 : vector<1x96xf32> to vector<16x96xf32>
      %15 = arith.addf %12, %14 : vector<16x96xf32>
      %16 = arith.truncf %15 : vector<16x96xf32> to vector<16x96xbf16>
      %c0_14 = arith.constant 0 : index
      %c0_15 = arith.constant 0 : index
      %17 = vector.load %arg6[%c0_14, %c0_15] : memref<16x96xbf16, #tpu.memory_space<vmem>>, vector<16x96xbf16>
      tpu.vector_store %arg6[%c0_14, %c0_15], %16 {strides = array<i32>} : memref<16x96xbf16, #tpu.memory_space<vmem>>, vector<16x96xbf16>,
    } else {
    }
    return
  }
  func.func @transform_0(%arg0: i32, %arg1: i32, %arg2: i32) -> (i32, i32) {
    %c0_i32 = arith.constant 0 : i32
    return %arg0, %arg2 : i32, i32
  }
  func.func @transform_1(%arg0: i32, %arg1: i32, %arg2: i32) -> (i32, i32) {
    %c0_i32 = arith.constant 0 : i32
    return %arg2, %arg1 : i32, i32
  }
  func.func @transform_2(%arg0: i32, %arg1: i32, %arg2: i32) -> (i32, i32) {
    %c0_i32 = arith.constant 0 : i32
    %c0_i32_0 = arith.constant 0 : i32
    return %c0_i32, %arg1 : i32, i32
  }
  func.func @transform_3(%arg0: i32, %arg1: i32, %arg2: i32) -> (i32, i32) {
    %c0_i32 = arith.constant 0 : i32
    return %arg0, %arg1 : i32, i32
  }
}

module attributes {stable_mosaic.version = 11 : i64} {
  func.func @_linear_kernel(%arg0: i32, %arg1: i32, %arg2: i32, %arg3: memref<16x32xbf16, #tpu.memory_space<vmem>>, %arg4: memref<32x32xbf16, #tpu.memory_space<vmem>>, %arg5: memref<1x32xf32, #tpu.memory_space<vmem>>, %arg6: memref<16x32xf32, #tpu.memory_space<vmem>>, %arg7: memref<16x32xf32, #tpu.memory_space<vmem>>) attributes {dimension_semantics = [#tpu.dimension_semantics<parallel>, #tpu.dimension_semantics<parallel>, #tpu.dimension_semantics<arbitrary>], iteration_bounds = array<i64: 1, 1, 1>, scalar_prefetch = 0 : i64, scratch_operands = 1 : i64, tpu.core_type = #tpu.core_type<tc>, window_params = [{transform_indices = @transform_0, window_bounds = array<i64: 16, 32>}, {transform_indices = @transform_1, window_bounds = array<i64: 32, 32>}, {transform_indices = @transform_2, window_bounds = array<i64: 1, 32>}, {transform_indices = @transform_3, window_bounds = array<i64: 16, 32>}]} {
    %c0_i32 = arith.constant 0 : i32
    %0 = arith.cmpi eq, %arg2, %c0_i32 : i32
    %1 = arith.extui %0 : i1 to i32
    %c0_i32_0 = arith.constant 0 : i32
    %2 = arith.cmpi ne, %1, %c0_i32_0 : i32
    scf.if %2 {
      %cst_10 = arith.constant 0.000000e+00 : f32
      %12 = vector.broadcast %cst_10 : f32 to vector<16x32xf32>
      %c0_11 = arith.constant 0 : index
      %c0_12 = arith.constant 0 : index
      %13 = vector.load %arg7[%c0_11, %c0_12] : memref<16x32xf32, #tpu.memory_space<vmem>>, vector<16x32xf32>
      tpu.vector_store %arg7[%c0_11, %c0_12], %12 {strides = array<i32>} : memref<16x32xf32, #tpu.memory_space<vmem>>, vector<16x32xf32>,
    } else {
    }
    %c0 = arith.constant 0 : index
    %c0_1 = arith.constant 0 : index
    %3 = vector.load %arg7[%c0, %c0_1] : memref<16x32xf32, #tpu.memory_space<vmem>>, vector<16x32xf32>
    %c0_2 = arith.constant 0 : index
    %c0_3 = arith.constant 0 : index
    %4 = vector.load %arg3[%c0_2, %c0_3] : memref<16x32xbf16, #tpu.memory_space<vmem>>, vector<16x32xbf16>
    %c0_4 = arith.constant 0 : index
    %c0_5 = arith.constant 0 : index
    %5 = vector.load %arg4[%c0_4, %c0_5] : memref<32x32xbf16, #tpu.memory_space<vmem>>, vector<32x32xbf16>
    %cst = arith.constant dense<0.000000e+00> : vector<16x32xf32>
    %6 = tpu.matmul %4, %5, %cst {dimension_numbers = #tpu.dot_dimension_numbers<[1], [0], [0], [1], [0, 0, 1, 1], [], []>} : vector<16x32xbf16>, vector<32x32xbf16>, vector<16x32xf32> -> vector<16x32xf32>
    %7 = arith.addf %3, %6 : vector<16x32xf32>
    %c0_6 = arith.constant 0 : index
    %c0_7 = arith.constant 0 : index
    %8 = vector.load %arg7[%c0_6, %c0_7] : memref<16x32xf32, #tpu.memory_space<vmem>>, vector<16x32xf32>
    tpu.vector_store %arg7[%c0_6, %c0_7], %7 {strides = array<i32>} : memref<16x32xf32, #tpu.memory_space<vmem>>, vector<16x32xf32>,
    %c0_i32_8 = arith.constant 0 : i32
    %9 = arith.cmpi eq, %arg2, %c0_i32_8 : i32
    %10 = arith.extui %9 : i1 to i32
    %c0_i32_9 = arith.constant 0 : i32
    %11 = arith.cmpi ne, %10, %c0_i32_9 : i32
    scf.if %11 {
      %c0_10 = arith.constant 0 : index
      %c0_11 = arith.constant 0 : index
      %12 = vector.load %arg7[%c0_10, %c0_11] : memref<16x32xf32, #tpu.memory_space<vmem>>, vector<16x32xf32>
      %c0_12 = arith.constant 0 : index
      %c0_13 = arith.constant 0 : index
      %13 = vector.load %arg5[%c0_12, %c0_13] : memref<1x32xf32, #tpu.memory_space<vmem>>, vector<1x32xf32>
      %14 = vector.broadcast %13 : vector<1x32xf32> to vector<16x32xf32>
      %15 = arith.addf %12, %14 : vector<16x32xf32>
      %c0_14 = arith.constant 0 : index
      %c0_15 = arith.constant 0 : index
      %16 = vector.load %arg6[%c0_14, %c0_15] : memref<16x32xf32, #tpu.memory_space<vmem>>, vector<16x32xf32>
      tpu.vector_store %arg6[%c0_14, %c0_15], %15 {strides = array<i32>} : memref<16x32xf32, #tpu.memory_space<vmem>>, vector<16x32xf32>,
    } else {
    }
    return
  }
  func.func @transform_0(%arg0: i32, %arg1: i32, %arg2: i32) -> (i32, i32) {
    %c0_i32 = arith.constant 0 : i32
    return %arg0, %arg2 : i32, i32
  }
  func.func @transform_1(%arg0: i32, %arg1: i32, %arg2: i32) -> (i32, i32) {
    %c0_i32 = arith.constant 0 : i32
    return %arg2, %arg1 : i32, i32
  }
  func.func @transform_2(%arg0: i32, %arg1: i32, %arg2: i32) -> (i32, i32) {
    %c0_i32 = arith.constant 0 : i32
    %c0_i32_0 = arith.constant 0 : i32
    return %c0_i32, %arg1 : i32, i32
  }
  func.func @transform_3(%arg0: i32, %arg1: i32, %arg2: i32) -> (i32, i32) {
    %c0_i32 = arith.constant 0 : i32
    return %arg0, %arg1 : i32, i32
  }
}

module attributes {stable_mosaic.version = 11 : i64} {
  func.func @_attn_kernel(%arg0: i32, %arg1: memref<1x8x96xbf16, #tpu.memory_space<vmem>>, %arg2: memref<1x8x32xbf16, #tpu.memory_space<vmem>>, %arg3: memref<1x4x8x8xf32, #tpu.memory_space<vmem>>, %arg4: memref<1x4x8x8xf32, #tpu.memory_space<vmem>>) attributes {dimension_semantics = [#tpu.dimension_semantics<parallel>], iteration_bounds = array<i64: 2>, scalar_prefetch = 0 : i64, scratch_operands = 0 : i64, tpu.core_type = #tpu.core_type<tc>, window_params = [{transform_indices = @transform_0, window_bounds = array<i64: 1, 8, 96>}, {transform_indices = @transform_1, window_bounds = array<i64: 1, 8, 32>}, {transform_indices = @transform_2, window_bounds = array<i64: 1, 4, 8, 8>}, {transform_indices = @transform_3, window_bounds = array<i64: 1, 4, 8, 8>}]} {
    %c0 = arith.constant 0 : index
    %c0_0 = arith.constant 0 : index
    %c0_1 = arith.constant 0 : index
    %0 = vector.load %arg1[%c0, %c0_0, %c0_1] : memref<1x8x96xbf16, #tpu.memory_space<vmem>>, vector<1x8x96xbf16>
    %1 = vector.shape_cast %0 : vector<1x8x96xbf16> to vector<8x96xbf16>
    %2 = vector.extract_strided_slice %1 {offsets = [0, 0], sizes = [8, 32], strides = [1, 1]} : vector<8x96xbf16> to vector<8x32xbf16>
    %3 = vector.shape_cast %2 : vector<8x32xbf16> to vector<8x4x8xbf16>
    %4 = vector.extract_strided_slice %1 {offsets = [0, 32], sizes = [8, 32], strides = [1, 1]} : vector<8x96xbf16> to vector<8x32xbf16>
    %5 = vector.shape_cast %4 : vector<8x32xbf16> to vector<8x4x8xbf16>
    %6 = vector.extract_strided_slice %1 {offsets = [0, 64], sizes = [8, 32], strides = [1, 1]} : vector<8x96xbf16> to vector<8x32xbf16>
    %7 = vector.shape_cast %6 : vector<8x32xbf16> to vector<8x4x8xbf16>
    %8 = tpu.transpose %3, [1, 0, 2] : vector<8x4x8xbf16> -> vector<4x8x8xbf16>
    %9 = tpu.transpose %5, [1, 0, 2] : vector<8x4x8xbf16> -> vector<4x8x8xbf16>
    %10 = tpu.transpose %7, [1, 0, 2] : vector<8x4x8xbf16> -> vector<4x8x8xbf16>
    %11 = arith.extf %9 : vector<4x8x8xbf16> to vector<4x8x8xf32>
    %c0_2 = arith.constant 0 : index
    %c0_3 = arith.constant 0 : index
    %c0_4 = arith.constant 0 : index
    %c0_5 = arith.constant 0 : index
    %12 = vector.load %arg3[%c0_2, %c0_3, %c0_4, %c0_5] : memref<1x4x8x8xf32, #tpu.memory_space<vmem>>, vector<1x4x8x8xf32>
    %13 = vector.shape_cast %12 : vector<1x4x8x8xf32> to vector<4x8x8xf32>
    %14 = vector.shape_cast %11 : vector<4x8x8xf32> to vector<1x4x8x8xf32>
    tpu.vector_store %arg3[%c0_2, %c0_3, %c0_4, %c0_5], %14 {strides = array<i32>} : memref<1x4x8x8xf32, #tpu.memory_space<vmem>>, vector<1x4x8x8xf32>,
    %15 = arith.extf %10 : vector<4x8x8xbf16> to vector<4x8x8xf32>
    %c0_6 = arith.constant 0 : index
    %c0_7 = arith.constant 0 : index
    %c0_8 = arith.constant 0 : index
    %c0_9 = arith.constant 0 : index
    %16 = vector.load %arg4[%c0_6, %c0_7, %c0_8, %c0_9] : memref<1x4x8x8xf32, #tpu.memory_space<vmem>>, vector<1x4x8x8xf32>
    %17 = vector.shape_cast %16 : vector<1x4x8x8xf32> to vector<4x8x8xf32>
    %18 = vector.shape_cast %15 : vector<4x8x8xf32> to vector<1x4x8x8xf32>
    tpu.vector_store %arg4[%c0_6, %c0_7, %c0_8, %c0_9], %18 {strides = array<i32>} : memref<1x4x8x8xf32, #tpu.memory_space<vmem>>, vector<1x4x8x8xf32>,
    "tpu.trace_start"() <{level = 10 : i32, message = "hqd,hkd->hqk"}> : () -> ()
    %cst = arith.constant dense<0.000000e+00> : vector<4x8x8xf32>
    %19 = tpu.matmul %8, %9, %cst {dimension_numbers = #tpu.dot_dimension_numbers<[2], [2], [1], [1], [0, 0, 0, 1, 1, 1], [0], [0]>} : vector<4x8x8xbf16>, vector<4x8x8xbf16>, vector<4x8x8xf32> -> vector<4x8x8xf32>
    "tpu.trace_stop"() : () -> ()
    %20 = tpu.iota {dimensions = array<i32: 0>} : vector<8x8xi32>
    %21 = tpu.iota {dimensions = array<i32: 1>} : vector<8x8xi32>
    %22 = arith.cmpi sle, %21, %20 : vector<8x8xi32>
    %23 = vector.shape_cast %22 : vector<8x8xi1> to vector<1x8x8xi1>
    %cst_10 = arith.constant 0xFF800000 : f32
    %24 = vector.shape_cast %23 : vector<1x8x8xi1> to vector<1x8x8xi1>
    %25 = vector.broadcast %24 : vector<1x8x8xi1> to vector<4x8x8xi1>
    %26 = vector.broadcast %cst_10 : f32 to vector<4x8x8xf32>
    %27 = arith.select %25, %19, %26 : vector<4x8x8xi1>, vector<4x8x8xf32>
    %cst_11 = arith.constant dense<0xFF800000> : vector<4x8xf32>
    %28 = vector.multi_reduction <maximumf>, %27, %cst_11 [2] : vector<4x8x8xf32> to vector<4x8xf32>
    %29 = vector.shape_cast %28 : vector<4x8xf32> to vector<4x8x1xf32>
    %30 = vector.broadcast %29 : vector<4x8x1xf32> to vector<4x8x8xf32>
    %31 = arith.subf %27, %30 : vector<4x8x8xf32>
    %32 = math.exp %31 : vector<4x8x8xf32>
    %cst_12 = arith.constant dense<0.000000e+00> : vector<4x8xf32>
    %33 = vector.multi_reduction <add>, %32, %cst_12 [2] : vector<4x8x8xf32> to vector<4x8xf32>
    %34 = vector.shape_cast %33 : vector<4x8xf32> to vector<4x8x1xf32>
    %35 = arith.truncf %32 : vector<4x8x8xf32> to vector<4x8x8xbf16>
    "tpu.trace_start"() <{level = 10 : i32, message = "hqk,hkd->hqd"}> : () -> ()
    %cst_13 = arith.constant dense<0.000000e+00> : vector<4x8x8xf32>
    %36 = tpu.matmul %35, %10, %cst_13 {dimension_numbers = #tpu.dot_dimension_numbers<[2], [1], [1], [2], [0, 0, 0, 1, 1, 2], [0], [0]>} : vector<4x8x8xbf16>, vector<4x8x8xbf16>, vector<4x8x8xf32> -> vector<4x8x8xf32>
    "tpu.trace_stop"() : () -> ()
    %37 = tpu.reciprocal %34 {approx = true} : vector<4x8x1xf32> -> vector<4x8x1xf32>
    %38 = vector.broadcast %37 : vector<4x8x1xf32> to vector<4x8x8xf32>
    %39 = arith.mulf %36, %38 : vector<4x8x8xf32>
    %40 = tpu.transpose %39, [1, 0, 2] : vector<4x8x8xf32> -> vector<8x4x8xf32>
    %41 = vector.shape_cast %40 : vector<8x4x8xf32> to vector<8x32xf32>
    %42 = arith.truncf %41 : vector<8x32xf32> to vector<8x32xbf16>
    %c0_14 = arith.constant 0 : index
    %c0_15 = arith.constant 0 : index
    %c0_16 = arith.constant 0 : index
    %43 = vector.load %arg2[%c0_14, %c0_15, %c0_16] : memref<1x8x32xbf16, #tpu.memory_space<vmem>>, vector<1x8x32xbf16>
    %44 = vector.shape_cast %43 : vector<1x8x32xbf16> to vector<8x32xbf16>
    %45 = vector.shape_cast %42 : vector<8x32xbf16> to vector<1x8x32xbf16>
    tpu.vector_store %arg2[%c0_14, %c0_15, %c0_16], %45 {strides = array<i32>} : memref<1x8x32xbf16, #tpu.memory_space<vmem>>, vector<1x8x32xbf16>,
    return
  }
  func.func @transform_0(%arg0: i32) -> (i32, i32, i32) {
    %c0_i32 = arith.constant 0 : i32
    %c0_i32_0 = arith.constant 0 : i32
    %c0_i32_1 = arith.constant 0 : i32
    return %arg0, %c0_i32, %c0_i32_0 : i32, i32, i32
  }
  func.func @transform_1(%arg0: i32) -> (i32, i32, i32) {
    %c0_i32 = arith.constant 0 : i32
    %c0_i32_0 = arith.constant 0 : i32
    %c0_i32_1 = arith.constant 0 : i32
    return %arg0, %c0_i32, %c0_i32_0 : i32, i32, i32
  }
  func.func @transform_2(%arg0: i32) -> (i32, i32, i32, i32) {
    %c0_i32 = arith.constant 0 : i32
    %c0_i32_0 = arith.constant 0 : i32
    %c0_i32_1 = arith.constant 0 : i32
    %c0_i32_2 = arith.constant 0 : i32
    return %arg0, %c0_i32, %c0_i32_0, %c0_i32_1 : i32, i32, i32, i32
  }
  func.func @transform_3(%arg0: i32) -> (i32, i32, i32, i32) {
    %c0_i32 = arith.constant 0 : i32
    %c0_i32_0 = arith.constant 0 : i32
    %c0_i32_1 = arith.constant 0 : i32
    %c0_i32_2 = arith.constant 0 : i32
    return %arg0, %c0_i32, %c0_i32_0, %c0_i32_1 : i32, i32, i32, i32
  }
}

</mosaic_0001>

<bundles_post_ra>
// kernel: mha_forward.5
= control target key start
LH: loop header
LB: loop body
LE: loop exit
PB: predicated region body
PF: predicated region fallthrough
CT: control target
= control target key end

     0   :  { %v175_v1 = vmov 0.0   ;;  %vm176_vm0 = vmmov 0   ;;  %vm20_vm1 = vcmask 261120   ;;  %s222_s0 = inlined_call_operand.vmem [shape: bf16[16,32], index: 0, kind: input, shape index: {}]   ;;  %s223_s1 = inlined_call_operand.vmem [shape: bf16[32,32], index: 1, kind: input, shape index: {}]   ;;  %s224_s2 = inlined_call_operand.vmem [shape: f32[1,32], index: 2, kind: input, shape index: {}]   ;;  %s225_s3 = inlined_call_operand.hbm [shape: f32[16,32], index: 3, kind: output, shape index: {}]  }
   0x1   :  { %v150_v0 = vld [vmem:[%s223_s1 + $0x8] sm:$0xff]   ;;  %137 = vmatprep.subr.bf16.mxu0 %v175_v1  ;;  %v151_v2 = vld [vmem:[%s223_s1] sm:$0xff]   ;;  %141 = vmatprep.mubr.msk.bf16.mxu0 %vm176_vm0, %v175_v1  ;;  %21 = vst.msk [vmem:[#allocation2] sm:$0xff] %vm20_vm1, %v175_v1  ;;  %22 = vst.msk [vmem:[#allocation2 + $0x8] sm:$0xff] %vm20_vm1, %v175_v1 }
   0x2   :  { %138 = vmatpush3.bf16.msra.mxu0 %v150_v0 }
   0x3   :  { %139 = vmatprep.subr.bf16.mxu0 %v175_v1 }
   0x4   :  { %8 = vsyncpa [#allocation4], 0  ;;  %v152_v3 = vld [vmem:[%s222_s0] sm:$0xff]   ;;  %s177_s0 = smov [#allocation3]  }
   0x5   :  { %v133_v12 = vld [vmem:[%s224_s2] ss:$0 sm:$0xff]  ;;  %s118_s19 = sshll.u32 %s177_s0, 4  ;;  %s119_s19 = int_to_ptr.vmem [resolvable:$true] %s118_s19 }
   0x6   :  { %140 = vmatpush3.bf16.msra.mxu0 %v151_v2  ;;  %s153_s20 = scalar_lea.vmem %s119_s19, 256  ;;  %p158_p1 = scmp.lt.s32.totalorder %s119_s19, %s119_s19 }
   0x7   :  { %p154_p0 = scmp.ne.s32.totalorder %s119_s19, %s153_s20  ;;  %p159_p2 = scmp.lt.s32.totalorder %s153_s20, %s153_s20 }
   0x8   :  { %v23_v4 = vld [vmem:[#allocation2] sm:$0xff]  ;;  %v24_v8 = vld [vmem:[#allocation2 + $0x8] sm:$0xff] }
   0x9   :  { %142 = vmatmul.mubr.msk.bf16.vlgmr.msra.gmra.mxu0 %vm20_vm1, %v152_v3  ;;  %p160_p3 = por %p159_p2, %p158_p1 }
   0xb   :  { %p161_p4 = pnand %p160_p3, %p154_p0 }
  0xc9   :  { %v86_v5 = vpop.f32.mrf.mxu0 }
  0xca   :  { %v93_v6 = vadd.f32 %v86_v5, %v23_v4 }
  0xcb   :  { %v143_v7 = vpop.f32.mrf.mxu0 }
  0xcc   :  { %95 = vst.msk [vmem:[#allocation2] sm:$0xff] %vm20_vm1, %v93_v6 }
  0xcd   :  { %v89_v9 = vpop.f32.mrf.mxu0 }
  0xce   :  { %v94_v10 = vadd.f32 %v89_v9, %v24_v8 }
  0xcf   :  { %v144_v11 = vpop.f32.mrf.mxu0 }
  0xd0   :  { %96 = vst.msk [vmem:[#allocation2 + $0x8] sm:$0xff] %vm20_vm1, %v94_v10 }
  0xd3   :  { %v100_v13 = vld [vmem:[#allocation2] sm:$0xff] }
  0xd4   :  { %v109_v14 = vadd.f32 %v133_v12, %v100_v13 }
  0xd6   :  { %111 = vst.msk [vmem:[#allocation3] sm:$0xff] %vm20_vm1, %v109_v14 }
  0xd7   :  { %v101_v15 = vld [vmem:[#allocation2 + $0x8] sm:$0xff] }
  0xd8   :  { %v110_v16 = vadd.f32 %v133_v12, %v101_v15 }
  0xda   :  { %112 = vst.msk [vmem:[#allocation3 + $0x8] sm:$0xff] %vm20_vm1, %v110_v16 }
  0xdb   :  { %164 = shalt.err (!%p161_p4)
}
  0xdc   :  { %s178_s21 = smov 128   ;;  %s179_s2 = smov 8  }
  0xdd   :  { %124 = dma.vmem_to_hbm [thread:$0]  %s119_s19, 256, %s225_s3, [#allocation4], %s178_s21, %s178_s21, %s179_s2  }
  0xde   :  { %173 = dma.done.wait [#allocation4], 256  }
  0xdf   :  { %174 = vsyncadd [#allocation4], 4294967040 }
  0xe0   :  { %128 = vsyncpa [#allocation4], 1 }

// kernel: mha_forward.3
= control target key start
LH: loop header
LB: loop body
LE: loop exit
PB: predicated region body
PF: predicated region fallthrough
CT: control target
= control target key end

     0   :  { %vm19_vm0 = vcmask 785408   ;;  %v151_v0 = vmov 0.0   ;;  %vm152_vm1 = vmmov 0   ;;  %vm47_vm2 = vcmask 261120   ;;  %s195_s1 = inlined_call_operand.vmem [shape: bf16[32,96], index: 1, kind: input, shape index: {}]   ;;  %s196_s0 = inlined_call_operand.vmem [shape: bf16[16,32], index: 0, kind: input, shape index: {}]   ;;  %s197_s2 = inlined_call_operand.vmem [shape: f32[1,96], index: 2, kind: input, shape index: {}]   ;;  %s198_s3 = inlined_call_operand.vmem [shape: bf16[16,96], index: 3, kind: output, shape index: {}]  }
   0x1   :  { %138 = vmatprep.subr.bf16.mxu0 %v151_v0  ;;  %v148_v1 = vld [vmem:[%s195_s1 + $0x8] sm:$0xff]   ;;  %142 = vmatprep.mubr.msk.bf16.mxu0 %vm152_vm1, %v151_v0  ;;  %20 = vst.msk [vmem:[#allocation2] sm:$0xff] %vm19_vm0, %v151_v0  ;;  %21 = vst.msk [vmem:[#allocation2 + $0x8] sm:$0xff] %vm19_vm0, %v151_v0  ;;  %v149_v2 = vld [vmem:[%s195_s1] sm:$0xff]   ;;  %vm119_vm3 = vcmask 781312  }
   0x2   :  { %139 = vmatpush3.bf16.msra.mxu0 %v148_v1  ;;  %v150_v3 = vld [vmem:[%s196_s0] sm:$0xff]  }
   0x3   :  { %140 = vmatprep.subr.bf16.mxu0 %v151_v0  ;;  %v130_v12 = vld [vmem:[%s197_s2] ss:$0 sm:$0xff] }
   0x6   :  { %141 = vmatpush3.bf16.msra.mxu0 %v149_v2 }
   0x8   :  { %v22_v4 = vld [vmem:[#allocation2] sm:$0xff]  ;;  %v23_v8 = vld [vmem:[#allocation2 + $0x8] sm:$0xff] }
   0x9   :  { %143 = vmatmul.mubr.msk.bf16.vlgmr.msra.gmra.mxu0 %vm47_vm2, %v150_v3 }
  0xc9   :  { %v85_v5 = vpop.f32.mrf.mxu0 }
  0xca   :  { %v92_v6 = vadd.f32 %v85_v5, %v22_v4 }
  0xcb   :  { %v144_v7 = vpop.f32.mrf.mxu0 }
  0xcc   :  { %95 = vst.msk [vmem:[#allocation2] sm:$0xff] %vm19_vm0, %v92_v6 }
  0xcd   :  { %v88_v9 = vpop.f32.mrf.mxu0 }
  0xce   :  { %v93_v10 = vadd.f32 %v88_v9, %v23_v8 }
  0xcf   :  { %v145_v11 = vpop.f32.mrf.mxu0 }
  0xd0   :  { %96 = vst.msk [vmem:[#allocation2 + $0x8] sm:$0xff] %vm19_vm0, %v93_v10 }
  0xd3   :  { %v100_v13 = vld [vmem:[#allocation2] sm:$0xff] }
  0xd4   :  { %v109_v14 = vadd.f32 %v130_v12, %v100_v13 }
  0xd6   :  { %v133_v15 = vpack.c.bf16 %v109_v14, %v109_v14 }
  0xd7   :  { %v101_v16 = vld [vmem:[#allocation2 + $0x8] sm:$0xff] }
  0xd8   :  { %120 = vst.msk [vmem:[%s198_s3] sm:$0xf] %vm119_vm3, %v133_v15  ;;  %v110_v17 = vadd.f32 %v130_v12, %v101_v16 }
  0xda   :  { %v134_v18 = vpack.c.bf16 %v110_v17, %v110_v17 }
  0xdc   :  { %121 = vst.msk [vmem:[%s198_s3 + $0x4] sm:$0xf] %vm119_vm3, %v134_v18 }

// kernel: mha_forward.4
= control target key start
LH: loop header
LB: loop body
LE: loop exit
PB: predicated region body
PF: predicated region fallthrough
CT: control target
= control target key end

     0   :  { %9 = vsyncpa [#allocation3], 0  ;;  %s2059_s0 = inlined_call_operand.vmem [shape: bf16[2,8,96], index: 0, kind: input, shape index: {}]   ;;  %s2060_s1 = inlined_call_operand.vmem [shape: bf16[2,8,32], index: 1, kind: output, shape index: {0}]   ;;  %s2061_s2 = inlined_call_operand.hbm [shape: f32[2,4,8,8], index: 2, kind: output, shape index: {1}]   ;;  %s2062_s3 = inlined_call_operand.hbm [shape: f32[2,4,8,8], index: 3, kind: output, shape index: {2}]  }
   0x1   :  { %11 = vsyncpa [#allocation3 + $0x1], 0 }
   0x2   :  { %12 = vsyncpa [#allocation5], 0 }
   0x3   :  { %14 = vsyncpa [#allocation5 + $0x1], 0  ;;  %s1707_s12 = smov 0   ;;  %s1709_s13 = smov 0  }
   0x4   :  { %s1711_s14 = smov 0   ;;  %s1713_s15 = smov 0  }
   0x5 LB: > { %s1728_s16 = sadd.s32 4294967295, %s1669_s15   ;;  %s1407_s17 = sadd.s32 4294967294, %s1669_s15   ;;  %s1669_s15 = sphi %s1713_s15, %s2068_s15   ;;  %s1665_s14 = sphi %s1711_s14, %s2067_s14   ;;  %s1661_s13 = sphi %s1709_s13, %s2066_s13   ;;  %s1657_s12 = sphi %s1707_s12, %s2065_s12  }
   0x6   : > { %s1732_s18 = sadd.s32 1, %s1669_s15   ;;  %s79_s19 = sadd.s32 1, %s1665_s14 }
   0x7   : > { %s76_s20 = ssub.s32 %s1669_s15, %s1732_s18  ;;  %p89_p0 = scmp.ne.s32.totalorder %s1665_s14, %s1661_s13 }
   0x8   : > { %p77_p1 = scmp.eq.s32.totalorder %s76_s20, 0  ;;  %p90_p2 = scmp.eq.s32.totalorder %s1728_s16, 1 }
   0x9   : > { %p95_p3 = scmp.ne.s32.totalorder %s1661_s13, %s1657_s12  ;;  %p96_p4 = scmp.eq.s32.totalorder %s1407_s17, 1 }
   0xa   : > { %s1743_s21 = scalar_select %p77_p1, %s1665_s14, %s79_s19  }
   0xb   : > { %p1745_p5 = por %p90_p2, %p89_p0  ;;  %p1749_p6 = por %p96_p4, %p95_p3 }
   0xc   : > { %p1410_p7 = scmp.ge.s32.totalorder %s1669_s15, 1  ;;  %p147_p8 = scmp.lt.s32.totalorder %s1669_s15, 3 }
   0xe   : > { %p148_p9 = pnand %p1410_p7, %p147_p8 }
   0xf   : > { %p179_p10 = scmp.lt.s32.totalorder (!%p148_p9), %s1728_s16, 1  ;;  %s1671_s29 = smov (!%p148_p9), 120  }
  0x10   : > { %151 = sbr.rel (%p148_p9) target bundleno = 1062 (0x426), region = 24  ;;  %s1672_s30 = smov (!%p148_p9), 104  }
  0x11   : > { %s1673_s4 = smov (!%p148_p9), 112   ;;  %s1674_s5 = smov (!%p148_p9), 96  }
  0x12   : > { %s1676_s6 = smov (!%p148_p9), 64   ;;  %s1817_s7 = sand.u32 (!%p148_p9), 1, %s1661_s13  }
  0x13   : > { %s1411_s8 = sshll.u32 (!%p148_p9), %s1817_s7, 5  ;;  %s1439_s11 = sshll.u32 (!%p148_p9), %s1728_s16, 9 }
  0x14   : > { %s1828_s9 = scalar_lea.vmem (!%p148_p9), [#allocation2], %s1411_s8  ;;  %s1905_s10 = scalar_lea.vmem (!%p148_p9), [#allocation4], %s1411_s8 }
  0x15   : > { %s1757_s24 = scalar_select %p179_p10, %s1728_s16, 1  ;;  %v1675_v3 = vmov 0.0   ;;  %vm1677_vm0 = vmmov 0   ;;  %v1678_v5 = vmov 1983009808   ;;  %v212_v7 = vlaneseq }
  0x16   : > { %1457 = vmatprep.subr.bf16.mxu0 %v1675_v3  ;;  %1463 = vmatprep.subr.bf16.mxu1 %v1675_v3  ;;  %v210_v6 = vunpack.c.l.s4 %v1678_v5  ;;  %v1679_v17 = vmov 1934713408   ;;  %vm650_vm1 = vcmask 64512   ;;  %vm901_vm3 = vcmask 1043456   ;;  %s1273_s17 = sshll.u32 %s1828_s9, 4  ;;  %s1951_s26 = scalar_lea.hbm %s2061_s2, %s1439_s11  ;;  %s1953_s17 = int_to_ptr.vmem [resolvable:$true] %s1273_s17 }
  0x17   : > { %s1413_s25 = sshll.u32 %s1757_s24, 2  ;;  %1459 = vmatprep.mubr.msk.bf16.mxu0 %vm1677_vm0, %v1675_v3  ;;  %1465 = vmatprep.mubr.msk.bf16.mxu1 %vm1677_vm0, %v1675_v3  ;;  %v1782_v11 = vshrl.u32 %v212_v7, 7  ;;  %v227_v18 = vunpack.c.l.s4 %v1679_v17  ;;  %s1252_s27 = scalar_lea.sflag [#allocation3], %s1817_s7 }
  0x18   : > { %s182_s28 = scalar_lea.vmem %s2059_s0, %s1413_s25  ;;  %v211_v10 = vunpack.c.0.s8 %v210_v6 }
  0x19   : > { %v188_v0 = vld [vmem:[%s182_s28] sm:$0xf]  ;;  %v228_v27 = vunpack.c.0.s8 %v227_v18  ;;  %s1579_s28 = scalar_lea.vmem %s1953_s17, 512 }
  0x1a   : > { %190 = vrot.lane.b32.xlu0 %v188_v0, %s1671_s29  ;;  %194 = vrot.lane.b32.xlu1 %v188_v0, %s1672_s30  ;;  %v199_v12 = vshrl.u32 %v188_v0, 16  ;;  %v1785_v15 = vsub.s32 %v211_v10, %v1782_v11  ;;  %p1580_p11 = scmp.ne.s32.totalorder %s1953_s17, %s1579_s28  ;;  %s1681_s29 = smov [#allocation2]  }
  0x1b   : > { %v1794_v39 = vsub.s32 %v228_v27, %v1782_v11  ;;  %s1583_s30 = sshll.u32 %s1681_s29, 4  ;;  %s1584_s30 = int_to_ptr.vmem [resolvable:$false] %s1583_s30 }
  0x1c   : > { %p1581_p12 = pnand %p1580_p11, %p1745_p5  ;;  %p1586_p0 = scmp.lt.s32.totalorder %s1953_s17, %s1584_s30 }
  0x1e   : > { %192 = vrot.lane.b32.xlu0 %v188_v0, %s1673_s4  ;;  %276 = vrot.lane.b32.xlu1 %v188_v0, %s1674_s5  ;;  %p1582_p13 = pneg %p1581_p12  ;;  %s1585_s4 = scalar_lea.vmem %s1584_s30, 1024 }
  0x1f   : > { %p1587_p1 = scmp.lt.s32.totalorder %s1585_s4, %s1579_s28 }
  0x21   : > { %p1588_p2 = por %p1587_p1, %p1586_p0 }
  0x23   : > { %p1589_p3 = pnand %p1588_p2, %p1582_p13 }
  0x8c   : > { %v191_v1 = vpop.permute.xlu0 %190  ;;  %v1765_v2 = vpop.permute.xlu1 %194 }
  0x8d   : > { %278 = vrot.lane.b32.xlu0 %v191_v1, %s1674_s5  ;;  %v206_v8 = vshrl.u32 %v1765_v2, 16  ;;  %v200_v13 = vshrl.u32 %v191_v1, 16  ;;  %v198_v21 = vpack.i.b16 %v191_v1, %v188_v0 }
  0x8f   : > { %v201_v16 = vpack.i.b16 %v200_v13, %v199_v12  ;;  %v215_v30 = vrot.slane %v198_v21, %v1785_v15 }
  0x90   : > { %v1769_v4 = vpop.permute.xlu0 %192  ;;  %v277_v20 = vpop.permute.xlu1 %276 }
  0x91   : > { %282 = vrot.lane.b32.xlu0 %v1765_v2, %s1674_s5  ;;  %280 = vrot.lane.b32.xlu1 %v1769_v4, %s1674_s5  ;;  %v205_v9 = vshrl.u32 %v1769_v4, 16  ;;  %v204_v19 = vpack.i.b16 %v1765_v2, %v1769_v4  ;;  %v287_v24 = vshrl.u32 %v277_v20, 16  ;;  %v249_v26 = vrot.slane %v201_v16, %v1785_v15 }
  0x93   : > { %v207_v14 = vpack.i.b16 %v206_v8, %v205_v9  ;;  %v223_v28 = vrot.slane %v204_v19, %v1785_v15 }
  0x95   : > { %364 = vrot.lane.b32.xlu0 %v188_v0, %s1676_s6  ;;  %366 = vrot.lane.b32.xlu1 %v191_v1, %s1676_s6  ;;  %v257_v22 = vrot.slane %v207_v14, %v1785_v15  ;;  %v224_v40 = vcombine.low %v215_v30, %v223_v28  ;;  %v225_v41 = vcombine.high %v215_v30, %v223_v28 }
  0x97   : > { %v258_v31 = vcombine.low %v249_v26, %v257_v22  ;;  %v259_v32 = vcombine.high %v249_v26, %v257_v22  ;;  %v232_v51 = vrot.slane %v224_v40, %v1794_v39  ;;  %v239_v52 = vrot.slane %v225_v41, %v1794_v39 }
  0x99   : > { %v266_v45 = vrot.slane %v258_v31, %v1794_v39  ;;  %v273_v46 = vrot.slane %v259_v32, %v1794_v39  ;;  %v452_v63 = vcombine.low %v232_v51, %v239_v52  ;;  %v1415_v0 = vcombine.high %v232_v51, %v239_v52 }
  0x9b   : > { %v477_v57 = vcombine.low %v266_v45, %v273_v46  ;;  %v1416_v58 = vcombine.high %v266_v45, %v273_v46  ;;  %v459_v16 = vrot.slane %v452_v63, %v1785_v15  ;;  %v467_v17 = vrot.slane %v1415_v0, %v1785_v15 }
  0x9d   : > { %v484_v9 = vrot.slane %v477_v57, %v1785_v15  ;;  %v492_v10 = vrot.slane %v1416_v58, %v1785_v15  ;;  %v468_v22 = vcombine.low %v459_v16, %v467_v17 }
  0xff   : > { %v279_v23 = vpop.permute.xlu0 %278 }
 0x100   : > { %v288_v25 = vshrl.u32 %v279_v23, 16  ;;  %v286_v29 = vpack.i.b16 %v279_v23, %v277_v20  ;;  %v493_v20 = vcombine.low %v484_v9, %v492_v10  ;;  %v1680_v23 = vmov 0  }
 0x102   : > { %v289_v35 = vpack.i.b16 %v288_v25, %v287_v24  ;;  %v303_v42 = vrot.slane %v286_v29, %v1785_v15  ;;  %v500_v29 = vrot.slane %v493_v20, %v1794_v39 }
 0x103   : > { %v281_v33 = vpop.permute.xlu1 %280  ;;  %v283_v34 = vpop.permute.xlu0 %282 }
 0x104   : > { %v293_v36 = vshrl.u32 %v281_v33, 16  ;;  %v292_v37 = vpack.i.b16 %v283_v34, %v281_v33  ;;  %v294_v38 = vshrl.u32 %v283_v34, 16  ;;  %v337_v47 = vrot.slane %v289_v35, %v1785_v15 }
 0x106   : > { %v295_v43 = vpack.i.b16 %v294_v38, %v293_v36  ;;  %v311_v44 = vrot.slane %v292_v37, %v1785_v15  ;;  %v475_v38 = vrot.slane %v468_v22, %v1794_v39 }
 0x108   : > { %v312_v48 = vcombine.low %v303_v42, %v311_v44  ;;  %v313_v49 = vcombine.high %v303_v42, %v311_v44  ;;  %v345_v50 = vrot.slane %v295_v43, %v1785_v15  ;;  %v506_v42 = vshrl.u32 %v500_v29, 16 }
 0x109   : > { %v504_v44 = vpack.i.b16 %v500_v29, %v475_v38  ;;  %v505_v45 = vshrl.u32 %v475_v38, 16 }
 0x10a   : > { %v320_v53 = vrot.slane %v312_v48, %v1794_v39  ;;  %v327_v54 = vrot.slane %v313_v49, %v1794_v39  ;;  %v346_v55 = vcombine.low %v337_v47, %v345_v50  ;;  %v347_v56 = vcombine.high %v337_v47, %v345_v50 }
 0x10b   : > { %v507_v47 = vpack.i.b16 %v506_v42, %v505_v45  ;;  %v501_v48 = vcombine.high %v500_v29, %v1680_v23  ;;  %v476_v50 = vcombine.high %v475_v38, %v1680_v23 }
 0x10c   : > { %v354_v59 = vrot.slane %v346_v55, %v1794_v39  ;;  %v361_v60 = vrot.slane %v347_v56, %v1794_v39  ;;  %v514_v61 = vcombine.low %v320_v53, %v327_v54  ;;  %v1417_v62 = vcombine.high %v320_v53, %v327_v54 }
 0x10d   : > { %v512_v51 = vshrl.u32 %v501_v48, 16  ;;  %v510_v52 = vpack.i.b16 %v501_v48, %v476_v50  ;;  %v511_v53 = vshrl.u32 %v476_v50, 16  ;;  %v850_v55 = vand.u32 127, %v212_v7 }
 0x10e   : > { %v539_v1 = vcombine.low %v354_v59, %v361_v60  ;;  %v1418_v5 = vcombine.high %v354_v59, %v361_v60  ;;  %v521_v6 = vrot.slane %v514_v61, %v1785_v15  ;;  %v529_v8 = vrot.slane %v1417_v62, %v1785_v15 }
 0x10f   : > { %v513_v54 = vpack.i.b16 %v512_v51, %v511_v53  ;;  %vm851_vm2 = vcmp.le.s32.totalorder %v850_v55, %v1782_v11 }
 0x110   : > { %v530_v12 = vcombine.low %v521_v6, %v529_v8  ;;  %v546_v13 = vrot.slane %v539_v1, %v1785_v15  ;;  %v554_v14 = vrot.slane %v1418_v5, %v1785_v15 }
 0x112   : > { %v537_v18 = vrot.slane %v530_v12, %v1794_v39  ;;  %v555_v19 = vcombine.low %v546_v13, %v554_v14 }
 0x114   : > { %v562_v21 = vrot.slane %v555_v19, %v1794_v39  ;;  %v538_v24 = vcombine.high %v537_v18, %v1680_v23  ;;  %v568_v26 = vshrl.u32 %v537_v18, 16 }
 0x116   : > { %v566_v25 = vpack.i.b16 %v562_v21, %v537_v18  ;;  %v569_v27 = vshrl.u32 %v562_v21, 16  ;;  %v563_v28 = vcombine.high %v562_v21, %v1680_v23  ;;  %v576_v34 = vshrl.u32 %v538_v24, 16  ;;  %v365_v21 = vpop.permute.xlu0 %364 }
 0x118   : > { %v646_v30 = vunpack.c.l.bf16 %v566_v25  ;;  %v667_v31 = vsel %vm650_vm1, %v566_v25, 0  ;;  %v570_v32 = vpack.i.b16 %v569_v27, %v568_v26  ;;  %v574_v33 = vpack.i.b16 %v563_v28, %v538_v24 }
 0x119   : > { %1458 = vmatpush3.bf16.xpose.msra.mxu0 %v667_v31  ;;  %v577_v35 = vshrl.u32 %v563_v28, 16  ;;  %v375_v25 = vshrl.u32 %v365_v21, 16 }
 0x11a   : > { %651 = vst.msk [vmem:[%s1828_s9] sm:$0xff] %vm650_vm1, %v646_v30  ;;  %v647_v36 = vunpack.c.l.bf16 %v570_v32  ;;  %v713_v37 = vsel %vm650_vm1, %v570_v32, 0  ;;  %1469 = vmatprep.subr.bf16.mxu0 %v1675_v3  ;;  %v648_v40 = vunpack.c.l.bf16 %v574_v33  ;;  %v759_v46 = vsel %vm650_vm1, %v574_v33, 0 }
 0x11b   : > { %1464 = vmatpush3.bf16.xpose.msra.mxu1 %v713_v37  ;;  %v578_v41 = vpack.i.b16 %v577_v35, %v576_v34 }
 0x11c   : > { %652 = vst.msk [vmem:[%s1828_s9 + $0x8] sm:$0xff] %vm650_vm1, %v647_v36  ;;  %653 = vst.msk [vmem:[%s1828_s9 + $0x10] sm:$0xff] %vm650_vm1, %v648_v40  ;;  %1475 = vmatprep.subr.bf16.mxu1 %v1675_v3 }
 0x11d   : > { %v649_v43 = vunpack.c.l.bf16 %v578_v41  ;;  %v805_v49 = vsel %vm650_vm1, %v578_v41, 0 }
 0x11f   : > { %654 = vst.msk [vmem:[%s1828_s9 + $0x18] sm:$0xff] %vm650_vm1, %v649_v43 }
 0x120   : > { %1460 = vmatmul.mubr.msk.bf16.vlgmr.msra.gmra.mxu0 %vm650_vm1, %v504_v44 }
 0x121   : > { %1470 = vmatpush3.bf16.xpose.msra.mxu0 %v759_v46  ;;  %1471 = vmatprep.mubr.msk.bf16.mxu0 %vm1677_vm0, %v1675_v3 }
 0x122   : > { %1466 = vmatmul.mubr.msk.bf16.vlgmr.msra.gmra.mxu1 %vm650_vm1, %v507_v47  ;;  %1481 = vmatprep.subr.bf16.mxu0 %v1675_v3 }
 0x123   : > { %1476 = vmatpush3.bf16.xpose.msra.mxu1 %v805_v49  ;;  %1477 = vmatprep.mubr.msk.bf16.mxu1 %vm1677_vm0, %v1675_v3 }
 0x124   : > { %1487 = vmatprep.subr.bf16.mxu1 %v1675_v3 }
 0x128   : > { %1472 = vmatmul.mubr.msk.bf16.vlgmr.msra.gmra.mxu0 %vm650_vm1, %v510_v52 }
 0x129   : > { %1483 = vmatprep.mubr.msk.bf16.mxu0 %vm1677_vm0, %v1675_v3 }
 0x12a   : > { %1478 = vmatmul.mubr.msk.bf16.vlgmr.msra.gmra.mxu1 %vm650_vm1, %v513_v54 }
 0x12b   : > { %1489 = vmatprep.mubr.msk.bf16.mxu1 %vm1677_vm0, %v1675_v3 }
 0x1e0   : > { %v703_v56 = vpop.f32.mrf.mxu0 }
 0x1e1   : > { %v854_v57 = vsel %vm851_vm2, %v703_v56, -inf }
 0x1e2   : > { %v1461_v58 = vpop.f32.mrf.mxu0  ;;  %v749_v59 = vpop.f32.mrf.mxu1  ;;  %v858_v60 = vsel %vm650_vm1, %v854_v57, -inf }
 0x1e3   : > { %v855_v61 = vsel %vm851_vm2, %v749_v59, -inf  ;;  %859 = vmax.xlane.f32.xlu1 %v858_v60 }
 0x1e4   : > { %v706_v62 = vpop.f32.mrf.mxu0  ;;  %v1467_v63 = vpop.f32.mrf.mxu1  ;;  %v861_v0 = vsel %vm650_vm1, %v855_v61, -inf }
 0x1e5   : > { %862 = vmax.xlane.f32.xlu0 %v861_v0 }
 0x1e6   : > { %v1462_v7 = vpop.f32.mrf.mxu0  ;;  %v752_v1 = vpop.f32.mrf.mxu1 }
 0x1e8   : > { %v1468_v5 = vpop.f32.mrf.mxu1  ;;  %v795_v6 = vpop.f32.mrf.mxu0 }
 0x1e9   : > { %v1874_v17 = vsel %vm851_vm2, %v795_v6, -inf }
 0x1ea   : > { %v1473_v8 = vpop.f32.mrf.mxu0  ;;  %v841_v9 = vpop.f32.mrf.mxu1  ;;  %v864_v19 = vsel %vm650_vm1, %v1874_v17, -inf }
 0x1eb   : > { %v1878_v18 = vsel %vm851_vm2, %v841_v9, -inf }
 0x1ec   : > { %v798_v10 = vpop.f32.mrf.mxu0  ;;  %v1479_v12 = vpop.f32.mrf.mxu1  ;;  %v867_v20 = vsel %vm650_vm1, %v1878_v18, -inf }
 0x1ee   : > { %v1474_v13 = vpop.f32.mrf.mxu0  ;;  %v844_v14 = vpop.f32.mrf.mxu1 }
 0x1f0   : > { %v1480_v16 = vpop.f32.mrf.mxu1 }
 0x1f4   : > { %368 = vrot.lane.b32.xlu1 %v1769_v4, %s1676_s6  ;;  %v367_v4 = vpop.permute.xlu1 %366 }
 0x1f5   : > { %v376_v24 = vshrl.u32 %v367_v4, 16  ;;  %v374_v29 = vpack.i.b16 %v367_v4, %v365_v21 }
 0x1f7   : > { %v377_v31 = vpack.i.b16 %v376_v24, %v375_v25  ;;  %v391_v36 = vrot.slane %v374_v29, %v1785_v15 }
 0x1f9   : > { %v425_v40 = vrot.slane %v377_v31, %v1785_v15 }
 0x1fb   : > { %370 = vrot.lane.b32.xlu0 %v1765_v2, %s1676_s6 }
 0x218   : > { %865 = vmax.xlane.f32.xlu1 %v864_v19 }
 0x21a   : > { %868 = vmax.xlane.f32.xlu0 %v867_v20 }
 0x26c   : > { %v860_v22 = vpop.xlane.xlu1 %859 }
 0x26d   : > { %v870_v2 = vsub.f32 %v854_v57, %v860_v22 }
 0x26e   : > { %v863_v26 = vpop.xlane.xlu0 %862 }
 0x26f   : > { %v874_v27 = vmul.f32 1.442695, %v870_v2  ;;  %v871_v28 = vsub.f32 %v855_v61, %v863_v26 }
 0x270   : > { %v369_v11 = vpop.permute.xlu1 %368 }
 0x271   : > { %1563 = vpow2.f32 %v874_v27  ;;  %v876_v30 = vmul.f32 1.442695, %v871_v28  ;;  %v381_v33 = vshrl.u32 %v369_v11, 16 }
 0x272   : > { %v371_v32 = vpop.permute.xlu0 %370 }
 0x273   : > { %1565 = vpow2.f32 %v876_v30  ;;  %v380_v34 = vpack.i.b16 %v371_v32, %v369_v11  ;;  %v382_v35 = vshrl.u32 %v371_v32, 16 }
 0x275   : > { %v383_v37 = vpack.i.b16 %v382_v35, %v381_v33  ;;  %v399_v38 = vrot.slane %v380_v34, %v1785_v15 }
 0x277   : > { %v400_v41 = vcombine.low %v391_v36, %v399_v38  ;;  %v401_v42 = vcombine.high %v391_v36, %v399_v38  ;;  %v433_v43 = vrot.slane %v383_v37, %v1785_v15 }
 0x279   : > { %v408_v44 = vrot.slane %v400_v41, %v1794_v39  ;;  %v415_v45 = vrot.slane %v401_v42, %v1794_v39  ;;  %v434_v46 = vcombine.low %v425_v40, %v433_v43  ;;  %v435_v47 = vcombine.high %v425_v40, %v433_v43 }
 0x27b   : > { %v442_v48 = vrot.slane %v434_v46, %v1794_v39  ;;  %v449_v49 = vrot.slane %v435_v47, %v1794_v39  ;;  %v580_v50 = vcombine.low %v408_v44, %v415_v45  ;;  %v1419_v51 = vcombine.high %v408_v44, %v415_v45 }
 0x27d   : > { %v587_v52 = vrot.slane %v580_v50, %v1785_v15  ;;  %v595_v53 = vrot.slane %v1419_v51, %v1785_v15  ;;  %v605_v54 = vcombine.low %v442_v48, %v449_v49  ;;  %v1420_v55 = vcombine.high %v442_v48, %v449_v49 }
 0x27e   : > { %v1564_v56 = vpop.eup %1563 }
 0x27f   : > { %v612_v57 = vrot.slane %v605_v54, %v1785_v15  ;;  %v620_v58 = vrot.slane %v1420_v55, %v1785_v15  ;;  %v882_v59 = vsel %vm650_vm1, %v1564_v56, 0.0  ;;  %v596_v60 = vcombine.low %v587_v52, %v595_v53 }
 0x280   : > { %v1566_v61 = vpop.eup %1565  ;;  %883 = vadd.xlane.f32.xlu0 %v882_v59 }
 0x281   : > { %v885_v62 = vsel %vm650_vm1, %v1566_v61, 0.0  ;;  %v603_v63 = vrot.slane %v596_v60, %v1794_v39  ;;  %v621_v0 = vcombine.low %v612_v57, %v620_v58  ;;  %v895_v24 = vpack.c.bf16 %v1566_v61, %v1566_v61 }
 0x282   : > { %886 = vadd.xlane.f32.xlu1 %v885_v62 }
 0x283   : > { %v628_v7 = vrot.slane %v621_v0, %v1794_v39  ;;  %v604_v1 = vcombine.high %v603_v63, %v1680_v23  ;;  %v634_v6 = vshrl.u32 %v603_v63, 16 }
 0x285   : > { %v632_v5 = vpack.i.b16 %v628_v7, %v603_v63  ;;  %v635_v8 = vshrl.u32 %v628_v7, 16  ;;  %v629_v9 = vcombine.high %v628_v7, %v1680_v23  ;;  %v642_v16 = vshrl.u32 %v604_v1, 16 }
 0x286   : > { %v894_v23 = vpack.c.bf16 %v1564_v56, %v1564_v56 }
 0x287   : > { %v655_v10 = vunpack.c.l.bf16 %v632_v5  ;;  %v903_v12 = vsel %vm901_vm3, %v632_v5, 0  ;;  %v636_v13 = vpack.i.b16 %v635_v8, %v634_v6  ;;  %v640_v14 = vpack.i.b16 %v629_v9, %v604_v1 }
 0x288   : > { %1482 = vmatpush3.bf16.msra.mxu0 %v903_v12  ;;  %v643_v19 = vshrl.u32 %v629_v9, 16 }
 0x289   : > { %659 = vst.msk [vmem:[%s1905_s10] sm:$0xff] %vm650_vm1, %v655_v10  ;;  %v656_v20 = vunpack.c.l.bf16 %v636_v13  ;;  %v949_v4 = vsel %vm901_vm3, %v636_v13, 0  ;;  %1493 = vmatprep.subr.bf16.mxu0 %v1675_v3  ;;  %v657_v21 = vunpack.c.l.bf16 %v640_v14  ;;  %v995_v2 = vsel %vm901_vm3, %v640_v14, 0 }
 0x28a   : > { %1488 = vmatpush3.bf16.msra.mxu1 %v949_v4  ;;  %v644_v22 = vpack.i.b16 %v643_v19, %v642_v16 }
 0x28b   : > { %660 = vst.msk [vmem:[%s1905_s10 + $0x8] sm:$0xff] %vm650_vm1, %v656_v20  ;;  %1484 = vmatmul.mubr.msk.bf16.vlgmr.msra.gmra.mxu0 %vm650_vm1, %v894_v23  ;;  %661 = vst.msk [vmem:[%s1905_s10 + $0x10] sm:$0xff] %vm650_vm1, %v657_v21  ;;  %1499 = vmatprep.subr.bf16.mxu1 %v1675_v3 }
 0x28c   : > { %1494 = vmatpush3.bf16.msra.mxu0 %v995_v2  ;;  %v658_v25 = vunpack.c.l.bf16 %v644_v22  ;;  %1495 = vmatprep.mubr.msk.bf16.mxu0 %vm1677_vm0, %v1675_v3  ;;  %v1041_v26 = vsel %vm901_vm3, %v644_v22, 0 }
 0x28d   : > { %1490 = vmatmul.mubr.msk.bf16.vlgmr.msra.gmra.mxu1 %vm650_vm1, %v895_v24 }
 0x28e   : > { %662 = vst.msk [vmem:[%s1905_s10 + $0x18] sm:$0xff] %vm650_vm1, %v658_v25  ;;  %1500 = vmatpush3.bf16.msra.mxu1 %v1041_v26  ;;  %1501 = vmatprep.mubr.msk.bf16.mxu1 %vm1677_vm0, %v1675_v3 }
 0x2a1   : > { %v866_v27 = vpop.xlane.xlu1 %865 }
 0x2a2   : > { %v872_v28 = vsub.f32 %v1874_v17, %v866_v27 }
 0x2a3   : > { %v869_v11 = vpop.xlane.xlu0 %868 }
 0x2a4   : > { %v878_v29 = vmul.f32 1.442695, %v872_v28  ;;  %v873_v30 = vsub.f32 %v1878_v18, %v869_v11 }
 0x2a6   : > { %1567 = vpow2.f32 %v878_v29  ;;  %v880_v31 = vmul.f32 1.442695, %v873_v30 }
 0x2a8   : > { %1569 = vpow2.f32 %v880_v31 }
 0x2b3   : > { %v1568_v32 = vpop.eup %1567 }
 0x2b4   : > { %v888_v33 = vsel %vm650_vm1, %v1568_v32, 0.0  ;;  %v896_v34 = vpack.c.bf16 %v1568_v32, %v1568_v32 }
 0x2b5   : > { %v1570_v35 = vpop.eup %1569  ;;  %889 = vadd.xlane.f32.xlu0 %v888_v33 }
 0x2b6   : > { %1496 = vmatmul.mubr.msk.bf16.vlgmr.msra.gmra.mxu0 %vm650_vm1, %v896_v34  ;;  %v891_v3 = vsel %vm650_vm1, %v1570_v35, 0.0  ;;  %v897_v36 = vpack.c.bf16 %v1570_v35, %v1570_v35 }
 0x2b7   : > { %892 = vadd.xlane.f32.xlu1 %v891_v3 }
 0x2b8   : > { %1502 = vmatmul.mubr.msk.bf16.vlgmr.msra.gmra.mxu1 %vm650_vm1, %v897_v36 }
 0x309   : > { %v884_v44 = vpop.xlane.xlu0 %883 }
 0x30a   : > { %1571 = vrcp.f32 %v884_v44 }
 0x30b   : > { %v887_v45 = vpop.xlane.xlu1 %886 }
 0x317   : > { %v1572_v48 = vpop.eup %1571 }
 0x33e   : > { %v890_v46 = vpop.xlane.xlu0 %889 }
 0x33f   : > { %1573 = vrcp.f32 %v890_v46 }
 0x340   : > { %v893_v47 = vpop.xlane.xlu1 %892  ;;  %1575 = vrcp.f32 %v887_v45 }
 0x341   : > { %1577 = vrcp.f32 %v893_v47 }
 0x34b   : > { %v939_v17 = vpop.f32.mrf.mxu0 }
 0x34c   : > { %v1574_v49 = vpop.eup %1573  ;;  %v1087_v52 = vmul.f32 %v1572_v48, %v939_v17 }
 0x34d   : > { %v1485_v37 = vpop.f32.mrf.mxu0  ;;  %v985_v18 = vpop.f32.mrf.mxu1 }
 0x34e   : > { %v1576_v51 = vpop.eup %1575 }
 0x34f   : > { %v942_v38 = vpop.f32.mrf.mxu0  ;;  %v1491_v40 = vpop.f32.mrf.mxu1  ;;  %v1088_v57 = vmul.f32 %v1576_v51, %v985_v18 }
 0x350   : > { %v1578_v54 = vpop.eup %1577 }
 0x351   : > { %v1486_v41 = vpop.f32.mrf.mxu0  ;;  %v988_v42 = vpop.f32.mrf.mxu1 }
 0x353   : > { %v1492_v43 = vpop.f32.mrf.mxu1 }
 0x376   : > { %v1031_v50 = vpop.f32.mrf.mxu0 }
 0x377   : > { %v1089_v53 = vmul.f32 %v1574_v49, %v1031_v50 }
 0x378   : > { %v1497_v55 = vpop.f32.mrf.mxu0  ;;  %v1077_v56 = vpop.f32.mrf.mxu1 }
 0x379   : > { %v1091_v58 = vcombine.low %v1087_v52, %v1089_v53  ;;  %v1092_v59 = vcombine.high %v1087_v52, %v1089_v53  ;;  %v1090_v60 = vmul.f32 %v1578_v54, %v1077_v56 }
 0x37a   : > { %v1034_v61 = vpop.f32.mrf.mxu0  ;;  %v1503_v62 = vpop.f32.mrf.mxu1 }
 0x37b   : > { %v1107_v63 = vcombine.low %v1088_v57, %v1090_v60  ;;  %v1108_v0 = vcombine.high %v1088_v57, %v1090_v60  ;;  %v1099_v5 = vrot.slane %v1091_v58, %v1785_v15  ;;  %v1106_v6 = vrot.slane %v1092_v59, %v1785_v15 }
 0x37c   : > { %v1498_v7 = vpop.f32.mrf.mxu0  ;;  %v1080_v1 = vpop.f32.mrf.mxu1 }
 0x37d   : > { %v1115_v8 = vrot.slane %v1107_v63, %v1785_v15  ;;  %v1122_v9 = vrot.slane %v1108_v0, %v1785_v15 }
 0x37e   : > { %v1504_v10 = vpop.f32.mrf.mxu1 }
 0x37f   : > { %v1123_v12 = vcombine.low %v1099_v5, %v1115_v8  ;;  %v1124_v13 = vcombine.high %v1099_v5, %v1115_v8  ;;  %v1139_v14 = vcombine.low %v1106_v6, %v1122_v9  ;;  %v1140_v16 = vcombine.high %v1106_v6, %v1122_v9 }
 0x381   : > { %v1131_v19 = vrot.slane %v1123_v12, %v1794_v39  ;;  %v1138_v20 = vrot.slane %v1124_v13, %v1794_v39  ;;  %v1147_v4 = vrot.slane %v1139_v14, %v1794_v39  ;;  %v1154_v23 = vrot.slane %v1140_v16, %v1794_v39 }
 0x383   : > { %v1159_v21 = vcombine.low %v1131_v19, %v1138_v20  ;;  %v1429_v22 = vcombine.high %v1131_v19, %v1138_v20  ;;  %v1175_v2 = vcombine.low %v1147_v4, %v1154_v23  ;;  %v1430_v24 = vcombine.high %v1147_v4, %v1154_v23 }
 0x385   : > { %v1166_v25 = vrot.slane %v1159_v21, %v1785_v15  ;;  %v1174_v26 = vrot.slane %v1429_v22, %v1785_v15  ;;  %v1182_v27 = vrot.slane %v1175_v2, %v1785_v15  ;;  %v1190_v28 = vrot.slane %v1430_v24, %v1785_v15 }
 0x387   : > { %v1192_v11 = vcombine.high %v1166_v25, %v1174_v26  ;;  %v1208_v29 = vcombine.high %v1182_v27, %v1190_v28  ;;  %v1191_v30 = vcombine.low %v1166_v25, %v1174_v26  ;;  %v1207_v31 = vcombine.low %v1182_v27, %v1190_v28 }
 0x389   : > { %v1956_v15 = vrot.slane %v1192_v11, %v1794_v39  ;;  %v1959_v32 = vrot.slane %v1208_v29, %v1794_v39  ;;  %v1962_v33 = vrot.slane %v1191_v30, %v1794_v39  ;;  %v1965_v34 = vrot.slane %v1207_v31, %v1794_v39 }
 0x38a   : > { %1592 = shalt.err (!%p1589_p3)
}
 0x38b   : > { %s1593_s5 = scalar_lea.hbm %s1951_s26, 512  ;;  %s1597_s9 = scalar_lea.hbm %s2061_s2, 1024 }
 0x38c   : > { %p1594_p4 = scmp.ne.s32.totalorder %s1951_s26, %s1593_s5  ;;  %p1598_p9 = scmp.lt.s32.totalorder %s1951_s26, %s2061_s2 }
 0x38d   : > { %p1599_p10 = scmp.lt.s32.totalorder %s1597_s9, %s1593_s5 }
 0x38e   : > { %p1595_p7 = pnand %p1594_p4, %p1745_p5 }
 0x38f   : > { %p1600_p11 = por %p1599_p10, %p1598_p9 }
 0x390   : > { %p1596_p8 = pneg %p1595_p7 }
 0x392   : > { %p1601_p12 = pnand %p1600_p11, %p1596_p8 }
 0x394   : > { %1604 = shalt.err (!%p1601_p12)
}
 0x395   : > { %s1682_s28 = smov 128   ;;  %s1683_s29 = smov 8   ;;  %v1225_v39 = vcombine.low %v1956_v15, %v1959_v32  ;;  %v1224_v35 = vcombine.high %v1962_v33, %v1965_v34  ;;  %v1223_v3 = vcombine.low %v1962_v33, %v1965_v34 }
 0x396   : > { %1505 = dma.vmem_to_hbm [thread:$0]  (%p1745_p5), %s1953_s17, 512, %s1951_s26, %s1252_s27, %s1682_s28, %s1682_s28, %s1683_s29  }
 0x397   : > { %s2004_s5 = scalar_lea.hbm %s2062_s3, %s1439_s11  ;;  %s1289_s6 = sshll.u32 %s1905_s10, 4  ;;  %1228 = vrot.lane.b32.xlu0 %v1224_v35, %s1683_s29  ;;  %s2007_s6 = int_to_ptr.vmem [resolvable:$true] %s1289_s6 }
 0x398   : > { %s1684_s17 = smov 16   ;;  %s1257_s26 = scalar_lea.sflag [#allocation5], %s1817_s7 }
 0x399   : > { %1232 = vrot.lane.b32.xlu1 %v1225_v39, %s1684_s17  ;;  %s1605_s27 = scalar_lea.vmem %s2007_s6, 512  ;;  %s1685_s16 = smov [#allocation4]  }
 0x39a   : > { %p1606_p13 = scmp.ne.s32.totalorder %s2007_s6, %s1605_s27  ;;  %s1609_s8 = sshll.u32 %s1685_s16, 4  ;;  %s1610_s8 = int_to_ptr.vmem [resolvable:$false] %s1609_s8 }
 0x39b   : > { %s1611_s11 = scalar_lea.vmem %s1610_s8, 1024  ;;  %p1612_p2 = scmp.lt.s32.totalorder %s2007_s6, %s1610_s8 }
 0x39c   : > { %p1607_p0 = pnand %p1606_p13, %p1745_p5  ;;  %p1613_p3 = scmp.lt.s32.totalorder %s1611_s11, %s1605_s27 }
 0x39e   : > { %p1608_p1 = pneg %p1607_p0  ;;  %p1614_p4 = por %p1613_p3, %p1612_p2 }
 0x3a0   : > { %p1615_p7 = pnand %p1614_p4, %p1608_p1 }
 0x3a2   : > { %1618 = shalt.err (!%p1615_p7)
}
 0x3a3   : > { %s1619_s10 = scalar_lea.hbm %s2004_s5, 512  ;;  %s1623_s19 = scalar_lea.hbm %s2062_s3, 1024 }
 0x3a4   : > { %p1620_p8 = scmp.ne.s32.totalorder %s2004_s5, %s1619_s10  ;;  %p1624_p11 = scmp.lt.s32.totalorder %s2004_s5, %s2062_s3 }
 0x3a5   : > { %p1625_p12 = scmp.lt.s32.totalorder %s1623_s19, %s1619_s10 }
 0x3a6   : > { %p1621_p9 = pnand %p1620_p8, %p1745_p5 }
 0x3a7   : > { %p1626_p13 = por %p1625_p12, %p1624_p11 }
 0x3a8   : > { %p1622_p10 = pneg %p1621_p9 }
 0x3aa   : > { %p1627_p0 = pnand %p1626_p13, %p1622_p10 }
 0x3ac   : > { %1630 = shalt.err (!%p1627_p0)
}
 0x3ad   : > { %1506 = dma.vmem_to_hbm [thread:$0]  (%p1745_p5), %s2007_s6, 512, %s2004_s5, %s1257_s26, %s1682_s28, %s1682_s28, %s1683_s29   ;;  %v1226_v36 = vcombine.high %v1956_v15, %v1959_v32  ;;  %vm1240_vm4 = vcmask 130048   ;;  %vm1242_vm5 = vcmask 195584   ;;  %vm1245_vm6 = vcmask 257024  }
 0x3ae   : > { %s1686_s4 = smov 24   ;;  %s186_s27 = scalar_lea.vmem %s2060_s1, %s1413_s25 }
 0x3af   : > { %1236 = vrot.lane.b32.xlu1 %v1226_v36, %s1686_s4 }
 0x409   : > { %v1229_v37 = vpop.permute.xlu0 %1228 }
 0x40a   : > { %v1239_v18 = vsel %vm650_vm1, %v1223_v3, %v1229_v37 }
 0x40b   : > { %v1233_v17 = vpop.permute.xlu1 %1232 }
 0x40c   : > { %v1241_v40 = vsel %vm1240_vm4, %v1239_v18, %v1233_v17 }
 0x421   : > { %v1237_v38 = vpop.permute.xlu1 %1236 }
 0x422   : > { %v1243_v41 = vsel %vm1242_vm5, %v1241_v40, %v1237_v38 }
 0x423   : > { %v1244_v42 = vpack.c.bf16 %v1243_v41, %v1243_v41 }
 0x425   : > { %1246 = vst.msk [vmem:[%s186_s27] sm:$0xf] %vm1245_vm6, %v1244_v42 }
 0x426 PF: > { %p1516_p5 = scmp.ge.s32.totalorder %s1669_s15, 2  ;;  %s1311_s28 = sand.u32 1, %s1657_s12  }
 0x427   : > { %s1312_s29 = scalar_lea.sflag [#allocation3], %s1311_s28 }
 0x428   : > { %p1510_p1 = pnand %p1516_p5, %p1749_p6 }
 0x42a   : > { %p1511_p2 = pneg %p1510_p1 }
 0x42c   : > { %1648 = dma.done.wait (%p1511_p2), %s1312_s29, 512  }
 0x42d   : > { %1650 = vsyncadd (%p1511_p2), %s1312_s29, 4294966784  ;;  %s1321_s24 = scalar_lea.sflag [#allocation5], %s1311_s28 }
 0x42e   : > { %1652 = dma.done.wait (%p1511_p2), %s1321_s24, 512  }
 0x42f   : > { %1654 = vsyncadd (%p1511_p2), %s1321_s24, 4294966784  ;;  %p17_p3 = scmp.ge.s32.totalorder %s1732_s18, 4   ;;  %s2065_s12 = smov %s1661_s13 }
 0x430   : > { %s2066_s13 = smov %s1665_s14  ;;  %s2067_s14 = smov %s1743_s21 }
 0x431   : > { %s2068_s15 = smov %s1732_s18  ;;  %19 = sbr.rel (!%p17_p3) target bundleno = 5 (0x5), region = 88 }
 0x436   :  { %1326 = vsyncpa [#allocation3], 1 }
 0x437   :  { %1328 = vsyncpa [#allocation3 + $0x1], 1 }
 0x438   :  { %1329 = vsyncpa [#allocation5], 1 }
 0x439   :  { %1331 = vsyncpa [#allocation5 + $0x1], 1 }

</bundles_post_ra>
